<compile_context>
chip_gen: v7x
topology: tpu7x:2x2x1
jax: 0.10.0
libtpu: 0.0.40
codegen_flags: <defaults>
</compile_context>

<pallas_src>
import functools

import jax
import jax.numpy as jnp
from jax.experimental import pallas as pl
from jax.experimental.pallas import tpu as pltpu


def _onehot_linear_kernel(idx_ref, I_ref, w_ref, b_ref, o_ref, oh_ref, *, T):
    # idx_ref: (T,) int32 in SMEM (scalar prefetch) — wrapped time indices.
    # I_ref:   (time_num, time_num) f32 in VMEM (the full I parameter).
    # w_ref:   (time_num, embed)    f32 in VMEM (Linear weight, transposed).
    # b_ref:   (1, embed)           f32 in VMEM.
    # o_ref:   (T, embed)           f32 output block.
    # oh_ref:  (T, time_num)        f32 VMEM scratch (gathered one-hot rows).

    # Gather the T rows of I at dynamic indices into scratch (static unrolled
    # loop, dynamic sublane-start loads).
    for t in range(T):
        oh_ref[pl.ds(t, 1), :] = I_ref[pl.ds(idx_ref[t], 1), :]

    # Single batched MXU matmul + bias add.
    acc = jnp.dot(oh_ref[...], w_ref[...], preferred_element_type=jnp.float32)
    o_ref[...] = (acc + b_ref[...]).astype(o_ref.dtype)


@functools.partial(jax.jit, static_argnames=("N", "T"))
def one_hot_encoder_forward(i, I, W, b, N=25, T=12):
    """i: scalar time index; I: (time_num, time_num); W: (embed, time_num)
    (PyTorch Linear layout); b: (embed,). Returns (N, T, embed)."""
    time_num = I.shape[0]
    embed = W.shape[0]

    # Row indices with wraparound — identical to the torch slicing + cat logic.
    idx = ((jnp.asarray(i, jnp.int32) % time_num)
           + jnp.arange(T, dtype=jnp.int32)) % time_num

    W_t = W.T                      # (time_num, embed)
    b2 = b.reshape(1, embed)       # (1, embed)

    kernel = functools.partial(_onehot_linear_kernel, T=T)

    out_t = pl.pallas_call(
        kernel,
        out_shape=jax.ShapeDtypeStruct((T, embed), jnp.float32),
        grid_spec=pltpu.PrefetchScalarGridSpec(
            num_scalar_prefetch=1,
            grid=(1,),  # single step — everything resident in VMEM
            in_specs=[
                pl.BlockSpec((time_num, time_num), lambda g, idx_ref: (0, 0)),
                pl.BlockSpec((time_num, embed), lambda g, idx_ref: (0, 0)),
                pl.BlockSpec((1, embed), lambda g, idx_ref: (0, 0)),
            ],
            out_specs=pl.BlockSpec((T, embed), lambda g, idx_ref: (0, 0)),
            scratch_shapes=[pltpu.VMEM((T, time_num), jnp.float32)],
        ),
        compiler_params=pltpu.CompilerParams(
            dimension_semantics=("arbitrary",)),
        cost_estimate=pl.CostEstimate(
            flops=2 * T * time_num * embed,
            transcendentals=0,
            bytes_accessed=4 * (time_num * time_num
                                + time_num * embed
                                + embed
                                + T * embed),
        ),
    )(idx, I, W_t, b2)

    # PyTorch .expand(N, T, time_num) followed by Linear -> same (T, embed)
    # slab for every n; broadcast lazily outside the kernel.
    return jnp.broadcast_to(out_t[None, :, :], (N, T, embed))


if __name__ == "__main__":
    embed_size = 32
    time_num = 288
    N, T = 25, 12
    i = 283  # exercises the wraparound branch: 283 % 288 + 12 > 288

    key = jax.random.PRNGKey(0)
    k_w, k_b = jax.random.split(key)

    # Parameters exactly as the module __init__ shapes them:
    #   I: eye(time_num, time_num), Linear(time_num, embed): W (embed, time_num), b (embed,)
    I = jnp.eye(time_num, dtype=jnp.float32)
    bound = 1.0 / (time_num ** 0.5)
    W = jax.random.uniform(k_w, (embed_size, time_num), jnp.float32, -bound, bound)
    b = jax.random.uniform(k_b, (embed_size,), jnp.float32, -bound, bound)

    out = one_hot_encoder_forward(i, I, W, b, N=N, T=T)
    out = jax.block_until_ready(out)
    assert out.shape == (N, T, embed_size)

    # Reference check in plain JAX (mirrors the torch slicing/cat + Linear).
    idx = ((i % time_num) + jnp.arange(T)) % time_num
    ref = jnp.broadcast_to((I[idx, :] @ W.T + b)[None], (N, T, embed_size))
    assert jnp.allclose(out, ref, atol=1e-5, rtol=1e-5)

    # Also exercise the non-wraparound branch.
    i2 = 7
    out2 = jax.block_until_ready(one_hot_encoder_forward(i2, I, W, b, N=N, T=T))
    idx2 = ((i2 % time_num) + jnp.arange(T)) % time_num
    ref2 = jnp.broadcast_to((I[idx2, :] @ W.T + b)[None], (N, T, embed_size))
    assert jnp.allclose(out2, ref2, atol=1e-5, rtol=1e-5)

    print("KERNEL_OK")
</pallas_src>

<mosaic_0001>
module attributes {stable_mosaic.version = 11 : i64} {
  func.func @_onehot_linear_kernel(%arg0: i32, %arg1: memref<12xi32, #tpu.memory_space<smem>>, %arg2: memref<288x288xf32, #tpu.memory_space<vmem>>, %arg3: memref<288x32xf32, #tpu.memory_space<vmem>>, %arg4: memref<1x32xf32, #tpu.memory_space<vmem>>, %arg5: memref<12x32xf32, #tpu.memory_space<vmem>>, %arg6: memref<12x288xf32, #tpu.memory_space<vmem>>) attributes {dimension_semantics = [#tpu.dimension_semantics<arbitrary>], iteration_bounds = array<i64: 1>, scalar_prefetch = 1 : i64, scratch_operands = 1 : i64, tpu.core_type = #tpu.core_type<tc>, window_params = [{pipeline_mode = #tpu.pipeline_mode<synchronous>, transform_indices = @transform_0, window_bounds = array<i64: 288, 288>}, {pipeline_mode = #tpu.pipeline_mode<synchronous>, transform_indices = @transform_1, window_bounds = array<i64: 288, 32>}, {pipeline_mode = #tpu.pipeline_mode<synchronous>, transform_indices = @transform_2, window_bounds = array<i64: 1, 32>}, {pipeline_mode = #tpu.pipeline_mode<synchronous>, transform_indices = @transform_3, window_bounds = array<i64: 12, 32>}]} {
    %c0 = arith.constant 0 : index
    %0 = memref.load %arg1[%c0] : memref<12xi32, #tpu.memory_space<smem>>
    %1 = arith.index_cast %0 : i32 to index
    %c0_0 = arith.constant 0 : index
    %2 = vector.load %arg2[%1, %c0_0] : memref<288x288xf32, #tpu.memory_space<vmem>>, vector<1x288xf32>
    %c0_1 = arith.constant 0 : index
    %c0_2 = arith.constant 0 : index
    %3 = vector.load %arg6[%c0_1, %c0_2] : memref<12x288xf32, #tpu.memory_space<vmem>>, vector<1x288xf32>
    tpu.vector_store %arg6[%c0_1, %c0_2], %2 {strides = array<i32>} : memref<12x288xf32, #tpu.memory_space<vmem>>, vector<1x288xf32>,
    %c1 = arith.constant 1 : index
    %4 = memref.load %arg1[%c1] : memref<12xi32, #tpu.memory_space<smem>>
    %5 = arith.index_cast %4 : i32 to index
    %c0_3 = arith.constant 0 : index
    %6 = vector.load %arg2[%5, %c0_3] : memref<288x288xf32, #tpu.memory_space<vmem>>, vector<1x288xf32>
    %c1_4 = arith.constant 1 : index
    %c0_5 = arith.constant 0 : index
    %7 = vector.load %arg6[%c1_4, %c0_5] : memref<12x288xf32, #tpu.memory_space<vmem>>, vector<1x288xf32>
    tpu.vector_store %arg6[%c1_4, %c0_5], %6 {strides = array<i32>} : memref<12x288xf32, #tpu.memory_space<vmem>>, vector<1x288xf32>,
    %c2 = arith.constant 2 : index
    %8 = memref.load %arg1[%c2] : memref<12xi32, #tpu.memory_space<smem>>
    %9 = arith.index_cast %8 : i32 to index
    %c0_6 = arith.constant 0 : index
    %10 = vector.load %arg2[%9, %c0_6] : memref<288x288xf32, #tpu.memory_space<vmem>>, vector<1x288xf32>
    %c2_7 = arith.constant 2 : index
    %c0_8 = arith.constant 0 : index
    %11 = vector.load %arg6[%c2_7, %c0_8] : memref<12x288xf32, #tpu.memory_space<vmem>>, vector<1x288xf32>
    tpu.vector_store %arg6[%c2_7, %c0_8], %10 {strides = array<i32>} : memref<12x288xf32, #tpu.memory_space<vmem>>, vector<1x288xf32>,
    %c3 = arith.constant 3 : index
    %12 = memref.load %arg1[%c3] : memref<12xi32, #tpu.memory_space<smem>>
    %13 = arith.index_cast %12 : i32 to index
    %c0_9 = arith.constant 0 : index
    %14 = vector.load %arg2[%13, %c0_9] : memref<288x288xf32, #tpu.memory_space<vmem>>, vector<1x288xf32>
    %c3_10 = arith.constant 3 : index
    %c0_11 = arith.constant 0 : index
    %15 = vector.load %arg6[%c3_10, %c0_11] : memref<12x288xf32, #tpu.memory_space<vmem>>, vector<1x288xf32>
    tpu.vector_store %arg6[%c3_10, %c0_11], %14 {strides = array<i32>} : memref<12x288xf32, #tpu.memory_space<vmem>>, vector<1x288xf32>,
    %c4 = arith.constant 4 : index
    %16 = memref.load %arg1[%c4] : memref<12xi32, #tpu.memory_space<smem>>
    %17 = arith.index_cast %16 : i32 to index
    %c0_12 = arith.constant 0 : index
    %18 = vector.load %arg2[%17, %c0_12] : memref<288x288xf32, #tpu.memory_space<vmem>>, vector<1x288xf32>
    %c4_13 = arith.constant 4 : index
    %c0_14 = arith.constant 0 : index
    %19 = vector.load %arg6[%c4_13, %c0_14] : memref<12x288xf32, #tpu.memory_space<vmem>>, vector<1x288xf32>
    tpu.vector_store %arg6[%c4_13, %c0_14], %18 {strides = array<i32>} : memref<12x288xf32, #tpu.memory_space<vmem>>, vector<1x288xf32>,
    %c5 = arith.constant 5 : index
    %20 = memref.load %arg1[%c5] : memref<12xi32, #tpu.memory_space<smem>>
    %21 = arith.index_cast %20 : i32 to index
    %c0_15 = arith.constant 0 : index
    %22 = vector.load %arg2[%21, %c0_15] : memref<288x288xf32, #tpu.memory_space<vmem>>, vector<1x288xf32>
    %c5_16 = arith.constant 5 : index
    %c0_17 = arith.constant 0 : index
    %23 = vector.load %arg6[%c5_16, %c0_17] : memref<12x288xf32, #tpu.memory_space<vmem>>, vector<1x288xf32>
    tpu.vector_store %arg6[%c5_16, %c0_17], %22 {strides = array<i32>} : memref<12x288xf32, #tpu.memory_space<vmem>>, vector<1x288xf32>,
    %c6 = arith.constant 6 : index
    %24 = memref.load %arg1[%c6] : memref<12xi32, #tpu.memory_space<smem>>
    %25 = arith.index_cast %24 : i32 to index
    %c0_18 = arith.constant 0 : index
    %26 = vector.load %arg2[%25, %c0_18] : memref<288x288xf32, #tpu.memory_space<vmem>>, vector<1x288xf32>
    %c6_19 = arith.constant 6 : index
    %c0_20 = arith.constant 0 : index
    %27 = vector.load %arg6[%c6_19, %c0_20] : memref<12x288xf32, #tpu.memory_space<vmem>>, vector<1x288xf32>
    tpu.vector_store %arg6[%c6_19, %c0_20], %26 {strides = array<i32>} : memref<12x288xf32, #tpu.memory_space<vmem>>, vector<1x288xf32>,
    %c7 = arith.constant 7 : index
    %28 = memref.load %arg1[%c7] : memref<12xi32, #tpu.memory_space<smem>>
    %29 = arith.index_cast %28 : i32 to index
    %c0_21 = arith.constant 0 : index
    %30 = vector.load %arg2[%29, %c0_21] : memref<288x288xf32, #tpu.memory_space<vmem>>, vector<1x288xf32>
    %c7_22 = arith.constant 7 : index
    %c0_23 = arith.constant 0 : index
    %31 = vector.load %arg6[%c7_22, %c0_23] : memref<12x288xf32, #tpu.memory_space<vmem>>, vector<1x288xf32>
    tpu.vector_store %arg6[%c7_22, %c0_23], %30 {strides = array<i32>} : memref<12x288xf32, #tpu.memory_space<vmem>>, vector<1x288xf32>,
    %c8 = arith.constant 8 : index
    %32 = memref.load %arg1[%c8] : memref<12xi32, #tpu.memory_space<smem>>
    %33 = arith.index_cast %32 : i32 to index
    %c0_24 = arith.constant 0 : index
    %34 = vector.load %arg2[%33, %c0_24] : memref<288x288xf32, #tpu.memory_space<vmem>>, vector<1x288xf32>
    %c8_25 = arith.constant 8 : index
    %c0_26 = arith.constant 0 : index
    %35 = vector.load %arg6[%c8_25, %c0_26] : memref<12x288xf32, #tpu.memory_space<vmem>>, vector<1x288xf32>
    tpu.vector_store %arg6[%c8_25, %c0_26], %34 {strides = array<i32>} : memref<12x288xf32, #tpu.memory_space<vmem>>, vector<1x288xf32>,
    %c9 = arith.constant 9 : index
    %36 = memref.load %arg1[%c9] : memref<12xi32, #tpu.memory_space<smem>>
    %37 = arith.index_cast %36 : i32 to index
    %c0_27 = arith.constant 0 : index
    %38 = vector.load %arg2[%37, %c0_27] : memref<288x288xf32, #tpu.memory_space<vmem>>, vector<1x288xf32>
    %c9_28 = arith.constant 9 : index
    %c0_29 = arith.constant 0 : index
    %39 = vector.load %arg6[%c9_28, %c0_29] : memref<12x288xf32, #tpu.memory_space<vmem>>, vector<1x288xf32>
    tpu.vector_store %arg6[%c9_28, %c0_29], %38 {strides = array<i32>} : memref<12x288xf32, #tpu.memory_space<vmem>>, vector<1x288xf32>,
    %c10 = arith.constant 10 : index
    %40 = memref.load %arg1[%c10] : memref<12xi32, #tpu.memory_space<smem>>
    %41 = arith.index_cast %40 : i32 to index
    %c0_30 = arith.constant 0 : index
    %42 = vector.load %arg2[%41, %c0_30] : memref<288x288xf32, #tpu.memory_space<vmem>>, vector<1x288xf32>
    %c10_31 = arith.constant 10 : index
    %c0_32 = arith.constant 0 : index
    %43 = vector.load %arg6[%c10_31, %c0_32] : memref<12x288xf32, #tpu.memory_space<vmem>>, vector<1x288xf32>
    tpu.vector_store %arg6[%c10_31, %c0_32], %42 {strides = array<i32>} : memref<12x288xf32, #tpu.memory_space<vmem>>, vector<1x288xf32>,
    %c11 = arith.constant 11 : index
    %44 = memref.load %arg1[%c11] : memref<12xi32, #tpu.memory_space<smem>>
    %45 = arith.index_cast %44 : i32 to index
    %c0_33 = arith.constant 0 : index
    %46 = vector.load %arg2[%45, %c0_33] : memref<288x288xf32, #tpu.memory_space<vmem>>, vector<1x288xf32>
    %c11_34 = arith.constant 11 : index
    %c0_35 = arith.constant 0 : index
    %47 = vector.load %arg6[%c11_34, %c0_35] : memref<12x288xf32, #tpu.memory_space<vmem>>, vector<1x288xf32>
    tpu.vector_store %arg6[%c11_34, %c0_35], %46 {strides = array<i32>} : memref<12x288xf32, #tpu.memory_space<vmem>>, vector<1x288xf32>,
    %c0_36 = arith.constant 0 : index
    %c0_37 = arith.constant 0 : index
    %48 = vector.load %arg6[%c0_36, %c0_37] : memref<12x288xf32, #tpu.memory_space<vmem>>, vector<12x288xf32>
    %c0_38 = arith.constant 0 : index
    %c0_39 = arith.constant 0 : index
    %49 = vector.load %arg3[%c0_38, %c0_39] : memref<288x32xf32, #tpu.memory_space<vmem>>, vector<288x32xf32>
    %cst = arith.constant dense<0.000000e+00> : vector<12x32xf32>
    %50 = tpu.matmul %48, %49, %cst {dimension_numbers = #tpu.dot_dimension_numbers<[1], [0], [0], [1], [0, 0, 1, 1], [], []>} : vector<12x288xf32>, vector<288x32xf32>, vector<12x32xf32> -> vector<12x32xf32>
    %c0_40 = arith.constant 0 : index
    %c0_41 = arith.constant 0 : index
    %51 = vector.load %arg4[%c0_40, %c0_41] : memref<1x32xf32, #tpu.memory_space<vmem>>, vector<1x32xf32>
    %52 = vector.broadcast %51 : vector<1x32xf32> to vector<12x32xf32>
    %53 = arith.addf %50, %52 : vector<12x32xf32>
    %c0_42 = arith.constant 0 : index
    %c0_43 = arith.constant 0 : index
    %54 = vector.load %arg5[%c0_42, %c0_43] : memref<12x32xf32, #tpu.memory_space<vmem>>, vector<12x32xf32>
    tpu.vector_store %arg5[%c0_42, %c0_43], %53 {strides = array<i32>} : memref<12x32xf32, #tpu.memory_space<vmem>>, vector<12x32xf32>,
    return
  }
  func.func @transform_0(%arg0: i32, %arg1: memref<12xi32, #tpu.memory_space<smem>>) -> (i32, i32) {
    %c0_i32 = arith.constant 0 : i32
    %c0_i32_0 = arith.constant 0 : i32
    %c0_i32_1 = arith.constant 0 : i32
    return %c0_i32, %c0_i32_0 : i32, i32
  }
  func.func @transform_1(%arg0: i32, %arg1: memref<12xi32, #tpu.memory_space<smem>>) -> (i32, i32) {
    %c0_i32 = arith.constant 0 : i32
    %c0_i32_0 = arith.constant 0 : i32
    %c0_i32_1 = arith.constant 0 : i32
    return %c0_i32, %c0_i32_0 : i32, i32
  }
  func.func @transform_2(%arg0: i32, %arg1: memref<12xi32, #tpu.memory_space<smem>>) -> (i32, i32) {
    %c0_i32 = arith.constant 0 : i32
    %c0_i32_0 = arith.constant 0 : i32
    %c0_i32_1 = arith.constant 0 : i32
    return %c0_i32, %c0_i32_0 : i32, i32
  }
  func.func @transform_3(%arg0: i32, %arg1: memref<12xi32, #tpu.memory_space<smem>>) -> (i32, i32) {
    %c0_i32 = arith.constant 0 : i32
    %c0_i32_0 = arith.constant 0 : i32
    %c0_i32_1 = arith.constant 0 : i32
    return %c0_i32, %c0_i32_0 : i32, i32
  }
}

</mosaic_0001>

<bundles_post_ra>
// kernel: one_hot_encoder_forward.1
= control target key start
LH: loop header
LB: loop body
LE: loop exit
PB: predicated region body
PF: predicated region fallthrough
CT: control target
= control target key end

     0   :  { %s853_s0 = inlined_call_operand.vmem [shape: s32[12], index: 0, kind: input, shape index: {}]   ;;  %s854_s1 = inlined_call_operand.hbm [shape: f32[288,288], index: 1, kind: input, shape index: {}]   ;;  %s855_s2 = inlined_call_operand.vmem [shape: f32[288,32], index: 2, kind: input, shape index: {}]   ;;  %s856_s3 = inlined_call_operand.vmem [shape: f32[1,32], index: 3, kind: input, shape index: {}]   ;;  %s857_s4 = inlined_call_operand.vmem [shape: f32[12,32], index: 4, kind: output, shape index: {}]  }
   0x1   :  { %s9_s17 = sshll.u32 %s853_s0, 4  ;;  %s10_s17 = int_to_ptr.vmem [resolvable:$true] %s9_s17 }
   0x2   :  { %s569_s18 = scalar_lea.vmem %s10_s17, 16  ;;  %p574_p1 = scmp.lt.s32.totalorder %s10_s17, %s10_s17 }
   0x3   :  { %p570_p0 = scmp.ne.s32.totalorder %s10_s17, %s569_s18  ;;  %p575_p2 = scmp.lt.s32.totalorder %s569_s18, %s569_s18 }
   0x5   :  { %p576_p3 = por %p575_p2, %p574_p1 }
   0x7   :  { %p577_p4 = pnand %p576_p3, %p570_p0 }
   0x9   :  { %580 = shalt.err (!%p577_p4)  }
   0xa   :  { %s607_s19 = smov [#allocation4]  }
   0xb   :  { %12 = dma.vmem_to_smem %s10_s17, 16, %s607_s19, [#allocation3] }
   0xc   :  { %603 = dma.done.wait [#allocation3], 16 }
   0xd   :  { %604 = vsyncadd [#allocation3], 4294967280 }
   0xe   :  { %14 = sfence }
   0xf   :  { %15 = vsyncpa [#allocation6], 0  ;;  %s608_s20 = smov [#allocation5]   ;;  %s581_s0 = scalar_lea.hbm %s854_s1, 13824 }
  0x10   :  { %s21_s21 = sshll.u32 %s608_s20, 4  ;;  %p582_p5 = scmp.ne.s32.totalorder %s854_s1, %s581_s0  ;;  %s22_s21 = int_to_ptr.vmem [resolvable:$true] %s21_s21 }
  0x11   :  { %p585_p6 = scmp.lt.u32.totalorder %s581_s0, %s854_s1 }
  0x13   :  { %p587_p7 = pnand %p585_p6, %p582_p5 }
  0x15   :  { %590 = shalt.err (!%p587_p7)
}
  0x16   :  { %s591_s28 = scalar_lea.vmem %s22_s21, 13824  ;;  %p596_p9 = scmp.lt.s32.totalorder %s22_s21, %s22_s21 }
  0x17   :  { %p592_p8 = scmp.ne.s32.totalorder %s22_s21, %s591_s28  ;;  %p597_p10 = scmp.lt.s32.totalorder %s591_s28, %s591_s28 }
  0x19   :  { %p598_p11 = por %p597_p10, %p596_p9 }
  0x1b   :  { %p599_p12 = pnand %p598_p11, %p592_p8 }
  0x1d   :  { %602 = shalt.err (!%p599_p12)
}
  0x1e   :  { %s609_s29 = smov 384   ;;  %s610_s30 = smov 24  }
  0x1f   :  { %27 = dma.hbm_to_vmem [thread:$0]  %s854_s1, 13824, %s22_s21, [#allocation6], %s609_s29, %s609_s29, %s610_s30  }
  0x20   :  { %605 = dma.done.wait [#allocation6], 13824  }
  0x21   :  { %606 = vsyncadd [#allocation6], 4294953472  ;;  %s651_s7 = sld [smem:[#allocation4]]  ;;  %s653_s8 = sld [smem:[#allocation4 + $0x1]]  ;;  %v216_v0 = vld [vmem:[%s855_s2 + $0x80] sm:$0xff]  ;;  %v217_v1 = vld [vmem:[%s855_s2 + $0x88] sm:$0xff]  ;;  %v45_v17 = vlaneseq }
  0x22   :  { %s655_s9 = sld [smem:[#allocation4 + $0x2]]  ;;  %s657_s10 = sld [smem:[#allocation4 + $0x3]]  ;;  %v200_v2 = vld [vmem:[%s855_s2] sm:$0xff]  ;;  %v525_v3 = vpack.c.bf16 %v217_v1, %v216_v0  ;;  %v201_v4 = vld [vmem:[%s855_s2 + $0x8] sm:$0xff]  ;;  %v218_v5 = vld [vmem:[%s855_s2 + $0x90] sm:$0xff]  ;;  %vm243_vm1 = vcmask 261120  }
  0x23   :  { %s659_s11 = sld [smem:[#allocation4 + $0x4]]  ;;  %s661_s12 = sld [smem:[#allocation4 + $0x5]]  ;;  %v219_v6 = vld [vmem:[%s855_s2 + $0x98] sm:$0xff]  ;;  %v527_v7 = vpack.c.bf16 %v201_v4, %v200_v2  ;;  %v202_v9 = vld [vmem:[%s855_s2 + $0x10] sm:$0xff]  ;;  %v220_v11 = vld [vmem:[%s855_s2 + $0xa0] sm:$0xff]  ;;  %vm739_vm0 = vcmp.lt.s32.totalorder %v45_v17, 288 }
  0x24   :  { %s663_s13 = sld [smem:[#allocation4 + $0x6]]  ;;  %s665_s1 = sld [smem:[#allocation4 + $0x7]]  ;;  %v529_v8 = vpack.c.bf16 %v219_v6, %v218_v5  ;;  %v203_v10 = vld [vmem:[%s855_s2 + $0x18] sm:$0xff]  ;;  %526 = vmatprep.subr.bf16.mxu0 %v525_v3  ;;  %v221_v12 = vld [vmem:[%s855_s2 + $0xa8] sm:$0xff]  ;;  %v204_v15 = vld [vmem:[%s855_s2 + $0x20] sm:$0xff]  ;;  %vm401_vm2 = vcmask 257024  }
  0x25   :  { %s667_s14 = sld [smem:[#allocation4 + $0x8]]  ;;  %s669_s15 = sld [smem:[#allocation4 + $0x9]]  ;;  %528 = vmatpush3.bf16.msra.mxu0 %v527_v7  ;;  %v531_v13 = vpack.c.bf16 %v203_v10, %v202_v9  ;;  %v533_v14 = vpack.c.bf16 %v221_v12, %v220_v11  ;;  %v205_v16 = vld [vmem:[%s855_s2 + $0x28] sm:$0xff]  ;;  %v222_v18 = vld [vmem:[%s855_s2 + $0xb0] sm:$0xff]  ;;  %v223_v19 = vld [vmem:[%s855_s2 + $0xb8] sm:$0xff] }
  0x26   :  { %s671_s16 = sld [smem:[#allocation4 + $0xa]]  ;;  %s673_s17 = sld [smem:[#allocation4 + $0xb]]  ;;  %530 = vmatprep.subr.bf16.mxu0 %v529_v8  ;;  %v535_v20 = vpack.c.bf16 %v205_v16, %v204_v15  ;;  %v537_v21 = vpack.c.bf16 %v223_v19, %v222_v18  ;;  %v206_v22 = vld [vmem:[%s855_s2 + $0x30] sm:$0xff]  ;;  %v207_v23 = vld [vmem:[%s855_s2 + $0x38] sm:$0xff]  ;;  %v224_v24 = vld [vmem:[%s855_s2 + $0xc0] sm:$0xff] }
  0x27   :  { %s36_s0 = sshra.s32 %s651_s7, 3  ;;  %s39_s24 = sand.u32 7, %s651_s7  ;;  %v225_v26 = vld [vmem:[%s855_s2 + $0xc8] sm:$0xff]  ;;  %v232_v27 = vld [vmem:[%s855_s2 + $0x100] sm:$0xff]  ;;  %v539_v33 = vpack.c.bf16 %v207_v23, %v206_v22  ;;  %v234_v38 = vld [vmem:[%s855_s2 + $0x110] sm:$0xff] }
  0x28   :  { %s444_s5 = smul.u32 24, %s36_s0  ;;  %s52_s6 = sshra.s32 %s653_s8, 3  ;;  %v233_v28 = vld [vmem:[%s855_s2 + $0x108] sm:$0xff]  ;;  %v208_v29 = vld [vmem:[%s855_s2 + $0x40] sm:$0xff]  ;;  %v541_v36 = vpack.c.bf16 %v225_v26, %v224_v24  ;;  %v235_v39 = vld [vmem:[%s855_s2 + $0x118] sm:$0xff] }
  0x29   :  { %s55_s23 = sand.u32 7, %s653_s8  ;;  %s446_s25 = smul.u32 24, %s52_s6  ;;  %532 = vmatpush3.bf16.msra.mxu0 %v531_v13  ;;  %v209_v30 = vld [vmem:[%s855_s2 + $0x48] sm:$0xff]  ;;  %v557_v31 = vpack.c.bf16 %v233_v28, %v232_v27  ;;  %v226_v40 = vld [vmem:[%s855_s2 + $0xd0] sm:$0xff]  ;;  %v227_v41 = vld [vmem:[%s855_s2 + $0xd8] sm:$0xff]  ;;  %v561_v42 = vpack.c.bf16 %v235_v39, %v234_v38 }
  0x2a   :  { %s709_s27 = sadd.s32 %s444_s5, %s39_s24  ;;  %s65_s28 = sshra.s32 %s655_s9, 3  ;;  %534 = vmatprep.subr.bf16.mxu0 %v533_v14  ;;  %v543_v44 = vpack.c.bf16 %v209_v30, %v208_v29  ;;  %v545_v45 = vpack.c.bf16 %v227_v41, %v226_v40  ;;  %v210_v46 = vld [vmem:[%s855_s2 + $0x50] sm:$0xff]  ;;  %v211_v47 = vld [vmem:[%s855_s2 + $0x58] sm:$0xff]  ;;  %v228_v48 = vld [vmem:[%s855_s2 + $0xe0] sm:$0xff] }
  0x2b   :  { %s712_s29 = sadd.s32 %s446_s25, %s55_s23  ;;  %s68_s7 = sand.u32 7, %s655_s9  ;;  %558 = vmatprep.subr.bf16.mxu1 %v557_v31  ;;  %v229_v49 = vld [vmem:[%s855_s2 + $0xe8] sm:$0xff]  ;;  %v547_v51 = vpack.c.bf16 %v211_v47, %v210_v46  ;;  %v212_v54 = vld [vmem:[%s855_s2 + $0x60] sm:$0xff]  ;;  %v230_v56 = vld [vmem:[%s855_s2 + $0xf0] sm:$0xff] }
  0x2c   :  { %s448_s21 = smul.u32 24, %s65_s28  ;;  %s78_s22 = sshra.s32 %s657_s10, 3  ;;  %560 = vmatpush3.bf16.msra.mxu1 %v557_v31  ;;  %v549_v53 = vpack.c.bf16 %v229_v49, %v228_v48  ;;  %v213_v55 = vld [vmem:[%s855_s2 + $0x68] sm:$0xff]  ;;  %v231_v57 = vld [vmem:[%s855_s2 + $0xf8] sm:$0xff]  ;;  %v214_v60 = vld [vmem:[%s855_s2 + $0x70] sm:$0xff] }
  0x2d   :  { %s81_s23 = sand.u32 7, %s657_s10  ;;  %s450_s25 = smul.u32 24, %s78_s22  ;;  %536 = vmatpush3.bf16.msra.mxu0 %v535_v20  ;;  %562 = vmatprep.subr.bf16.mxu1 %v561_v42  ;;  %v551_v59 = vpack.c.bf16 %v213_v55, %v212_v54  ;;  %v553_v61 = vpack.c.bf16 %v231_v57, %v230_v56  ;;  %v215_v62 = vld [vmem:[%s855_s2 + $0x78] sm:$0xff]  ;;  %v467_v13 = vld [vmem:[%s856_s3] ss:$0 sm:$0xff] }
  0x2e   :  { %s71_s0 = sadd.s32 %s448_s21, %s68_s7  ;;  %s91_s26 = sshra.s32 %s659_s11, 3  ;;  %538 = vmatprep.subr.bf16.mxu0 %v537_v21  ;;  %v555_v0 = vpack.c.bf16 %v215_v62, %v214_v60 }
  0x2f   :  { %s84_s18 = sadd.s32 %s450_s25, %s81_s23  ;;  %s94_s22 = sand.u32 7, %s659_s11 }
  0x30   :  { %s43_s23 = scalar_lea.vmem [#allocation5], %s709_s27  ;;  %s452_s25 = smul.u32 24, %s91_s26  ;;  %564 = vmatpush3.bf16.msra.mxu1 %v561_v42 }
  0x31   :  { %v44_v32 = vld [vmem:[%s43_s23] ss:$8 sm:$0x7]  ;;  %s104_s28 = sshra.s32 %s661_s12, 3  ;;  %s59_s11 = scalar_lea.vmem [#allocation5], %s712_s29  ;;  %540 = vmatpush3.bf16.msra.mxu0 %v539_v33 }
  0x32   :  { %49 = vst.msk [vmem:[#allocation2] ss:$8 sm:$0x7] %vm739_vm0, %v44_v32  ;;  %v60_v34 = vld [vmem:[%s59_s11] ss:$8 sm:$0x7]  ;;  %s97_s26 = sadd.s32 %s452_s25, %s94_s22  ;;  %542 = vmatprep.subr.bf16.mxu0 %v541_v36 }
  0x33   :  { %s72_s10 = scalar_lea.vmem [#allocation5], %s71_s0  ;;  %62 = vst.msk [vmem:[#allocation2 + $0x1] ss:$8 sm:$0x7] %vm739_vm0, %v60_v34  ;;  %s85_s27 = scalar_lea.vmem [#allocation5], %s84_s18 }
  0x34   :  { %v73_v35 = vld [vmem:[%s72_s10] ss:$8 sm:$0x7]  ;;  %s107_s7 = sand.u32 7, %s661_s12  ;;  %s454_s12 = smul.u32 24, %s104_s28 }
  0x35   :  { %75 = vst.msk [vmem:[#allocation2 + $0x2] ss:$8 sm:$0x7] %vm739_vm0, %v73_v35  ;;  %v86_v37 = vld [vmem:[%s85_s27] ss:$8 sm:$0x7]  ;;  %544 = vmatpush3.bf16.msra.mxu0 %v543_v44 }
  0x36   :  { %88 = vst.msk [vmem:[#allocation2 + $0x3] ss:$8 sm:$0x7] %vm739_vm0, %v86_v37  ;;  %s98_s18 = scalar_lea.vmem [#allocation5], %s97_s26  ;;  %s117_s22 = sshra.s32 %s663_s13, 3  ;;  %546 = vmatprep.subr.bf16.mxu0 %v545_v45 }
  0x37   :  { %v99_v43 = vld [vmem:[%s98_s18] ss:$8 sm:$0x7]  ;;  %s120_s30 = sand.u32 7, %s663_s13  ;;  %s110_s8 = sadd.s32 %s454_s12, %s107_s7 }
  0x38   :  { %101 = vst.msk [vmem:[#allocation2 + $0x4] ss:$8 sm:$0x7] %vm739_vm0, %v99_v43  ;;  %s456_s6 = smul.u32 24, %s117_s22  ;;  %s130_s13 = sshra.s32 %s665_s1, 3 }
  0x39   :  { %s111_s24 = scalar_lea.vmem [#allocation5], %s110_s8  ;;  %s133_s0 = sand.u32 7, %s665_s1  ;;  %548 = vmatpush3.bf16.msra.mxu0 %v547_v51 }
  0x3a   :  { %v112_v50 = vld [vmem:[%s111_s24] ss:$8 sm:$0x7]  ;;  %s123_s29 = sadd.s32 %s456_s6, %s120_s30  ;;  %s458_s5 = smul.u32 24, %s130_s13  ;;  %550 = vmatprep.subr.bf16.mxu0 %v549_v53 }
  0x3b   :  { %114 = vst.msk [vmem:[#allocation2 + $0x5] ss:$8 sm:$0x7] %vm739_vm0, %v112_v50  ;;  %s124_s19 = scalar_lea.vmem [#allocation5], %s123_s29  ;;  %s143_s20 = sshra.s32 %s667_s14, 3 }
  0x3c   :  { %v125_v52 = vld [vmem:[%s124_s19] ss:$8 sm:$0x7]  ;;  %s146_s21 = sand.u32 7, %s667_s14  ;;  %s136_s22 = sadd.s32 %s458_s5, %s133_s0 }
  0x3d   :  { %127 = vst.msk [vmem:[#allocation2 + $0x6] ss:$8 sm:$0x7] %vm739_vm0, %v125_v52  ;;  %s460_s30 = smul.u32 24, %s143_s20  ;;  %s156_s25 = sshra.s32 %s669_s15, 3  ;;  %552 = vmatpush3.bf16.msra.mxu0 %v551_v59 }
  0x3e   :  { %s137_s28 = scalar_lea.vmem [#allocation5], %s136_s22  ;;  %s159_s13 = sand.u32 7, %s669_s15  ;;  %554 = vmatprep.subr.bf16.mxu0 %v553_v61 }
  0x3f   :  { %v138_v58 = vld [vmem:[%s137_s28] ss:$8 sm:$0x7]  ;;  %s149_s11 = sadd.s32 %s460_s30, %s146_s21  ;;  %s462_s26 = smul.u32 24, %s156_s25 }
  0x40   :  { %140 = vst.msk [vmem:[#allocation2 + $0x7] ss:$8 sm:$0x7] %vm739_vm0, %v138_v58  ;;  %s150_s29 = scalar_lea.vmem [#allocation5], %s149_s11  ;;  %s169_s15 = sshra.s32 %s671_s16, 3 }
  0x41   :  { %v151_v63 = vld [vmem:[%s150_s29] ss:$8 sm:$0x7]  ;;  %s172_s0 = sand.u32 7, %s671_s16  ;;  %s162_s5 = sadd.s32 %s462_s26, %s159_s13  ;;  %556 = vmatpush3.bf16.msra.mxu0 %v555_v0 }
  0x42   :  { %153 = vst.msk [vmem:[#allocation2 + $0x18] ss:$8 sm:$0x7] %vm739_vm0, %v151_v63  ;;  %s464_s19 = smul.u32 24, %s169_s15  ;;  %s182_s20 = sshra.s32 %s673_s17, 3 }
  0x43   :  { %s163_s21 = scalar_lea.vmem [#allocation5], %s162_s5  ;;  %s185_s12 = sand.u32 7, %s673_s17 }
  0x44   :  { %v164_v1 = vld [vmem:[%s163_s21] ss:$8 sm:$0x7]  ;;  %s175_s9 = sadd.s32 %s464_s19, %s172_s0  ;;  %s466_s2 = smul.u32 24, %s182_s20 }
  0x45   :  { %166 = vst.msk [vmem:[#allocation2 + $0x19] ss:$8 sm:$0x7] %vm739_vm0, %v164_v1  ;;  %s176_s1 = scalar_lea.vmem [#allocation5], %s175_s9 }
  0x46   :  { %v177_v2 = vld [vmem:[%s176_s1] ss:$8 sm:$0x7]  ;;  %s188_s16 = sadd.s32 %s466_s2, %s185_s12 }
  0x47   :  { %v195_v3 = vld [vmem:[#allocation2 + $0x8] sm:$0xff]  ;;  %179 = vst.msk [vmem:[#allocation2 + $0x1a] ss:$8 sm:$0x7] %vm739_vm0, %v177_v2  ;;  %v196_v4 = vld [vmem:[#allocation2 + $0x10] sm:$0xff]  ;;  %v194_v5 = vld [vmem:[#allocation2] sm:$0xff] }
  0x48   :  { %314 = vmatprep.mubr.f32.mxu0 %v195_v3  ;;  %s189_s18 = scalar_lea.vmem [#allocation5], %s188_s16  ;;  %522 = vmatprep.mubr.msk.f32.mxu1 %vm243_vm1, %v196_v4 }
  0x49   :  { %v190_v6 = vld [vmem:[%s189_s18] ss:$8 sm:$0x7]  ;;  %315 = vmatmul.mubr.f32.vlgmr.msra.gmra.mrb[0].mxu0 %v194_v5 }
  0x4a   :  { %192 = vst.msk [vmem:[#allocation2 + $0x1b] ss:$8 sm:$0x7] %vm739_vm0, %v190_v6 }
  0x51   :  { %v198_v7 = vld [vmem:[#allocation2 + $0x20] sm:$0xf]  ;;  %v197_v8 = vld [vmem:[#allocation2 + $0x18] sm:$0xf]  ;;  %v199_v9 = vld [vmem:[#allocation2 + $0x28] sm:$0xf] }
  0x52   :  { %319 = vmatprep.mubr.f32.mxu0 %v198_v7  ;;  %523 = vmatmul.mubr.msk.f32.vlgmr.msra.gmra.mrb[0].mxu1 %vm243_vm1, %v199_v9 }
  0x53   :  { %320 = vmatmul.mubr.f32.gmra.mrb[2].mxu0 %v197_v8 }
 0x11c   :  { %v502_v10 = vpop.f32.mrb[0].mxu0 }
 0x11d   :  { %v503_v11 = vpop.f32.mrb[1].mxu0 }
 0x11e   :  { %v504_v12 = vadd.f32 %v503_v11, %v502_v10 }
 0x120   :  { %v317_v14 = vadd.f32 %v504_v12, %v467_v13 }
 0x125   :  { %v524_v15 = vpop.f32.mrb[0].mxu1 }
 0x126   :  { %v505_v16 = vpop.f32.mrb[2].mxu0  ;;  %v391_v17 = vpop.f32.mrb[1].mxu1 }
 0x127   :  { %v506_v18 = vpop.f32.mrb[3].mxu0  ;;  %v392_v19 = vadd.f32 %v391_v17, %v317_v14 }
 0x128   :  { %v507_v20 = vadd.f32 %v506_v18, %v505_v16 }
 0x129   :  { %400 = vst.msk [vmem:[%s857_s4] sm:$0xff] %vm243_vm1, %v392_v19 }
 0x12a   :  { %v322_v21 = vadd.f32 %v507_v20, %v467_v13 }
 0x12c   :  { %v397_v22 = vadd.f32 %v524_v15, %v322_v21 }
 0x12e   :  { %402 = vst.msk [vmem:[%s857_s4 + $0x8] sm:$0xf] %vm401_vm2, %v397_v22 }
 0x12f   :  { %407 = vsyncpa [#allocation6], 1 }

</bundles_post_ra>
